<compile_context>
chip_gen: v5e
topology: v5e:2x2
jax: 0.10.0
libtpu: 0.0.40
codegen_flags: <defaults>
</compile_context>

<pallas_src>
import math
from functools import partial

import jax
import jax.numpy as jnp
from jax.experimental import pallas as pl
from jax.experimental.pallas import tpu as pltpu


def _round_up(x: int, m: int) -> int:
    return ((x + m - 1) // m) * m


def _choose_row_tile(m: int) -> int:
    """Row tile: multiple of 8, capped at 256, >=2 grid steps when m allows."""
    if m <= 8:
        return 8
    half = max(8, ((m // 2) // 8) * 8)
    return min(256, half)


# ----------------------------------------------------------------------------
# fused PolyFC kernel: matmul (all `order` Linears at once) + bias +
# polynomial recursion + ReLU, all on one row tile.
# ----------------------------------------------------------------------------
def _polyfc_kernel(x_ref, w_ref, b_ref, o_ref, *, n_pad, order):
    # (tm, K) @ (K, order * n_pad) on the MXU, f32 accumulation.
    acc = jnp.dot(x_ref[...], w_ref[...], preferred_element_type=jnp.float32)
    acc = acc + b_ref[...]
    # Polynomial recursion y = y * x_i + x_i (y starts at 0 => y_0 = x_0).
    # Slices are 128-lane aligned because n_pad is a multiple of 128.
    y = acc[:, 0:n_pad]
    for i in range(1, order):
        x_i = acc[:, i * n_pad:(i + 1) * n_pad]
        y = y * x_i + x_i
    o_ref[...] = jnp.maximum(y, 0.0)               # ReLU


# ----------------------------------------------------------------------------
# wrapper
# ----------------------------------------------------------------------------
def polyfc_forward(x, w_cat, b_cat, *, out_size, order, use_bf16=True):
    """x: (..., in_size) -> (..., out_size); matches PolyFC.forward."""
    in_size = w_cat.shape[0]
    n_pad = w_cat.shape[1] // order                # lane-padded per-Linear width

    lead = x.shape[:-1]
    m = int(math.prod(lead)) if lead else 1
    x2 = x.reshape(m, in_size)

    tm = _choose_row_tile(m)
    m_pad = _round_up(m, tm)
    if m_pad != m:
        x2 = jnp.pad(x2, ((0, m_pad - m), (0, 0)))  # zero rows, sliced off below

    mxu_dtype = jnp.bfloat16 if use_bf16 else jnp.float32
    a = x2.astype(mxu_dtype)
    w = w_cat.astype(mxu_dtype)

    # TODO(synk): for very large in_size, add a K grid axis with a VMEM f32
    # accumulator (pl.when init/finalize); unnecessary at these sizes.
    out = pl.pallas_call(
        partial(_polyfc_kernel, n_pad=n_pad, order=order),
        out_shape=jax.ShapeDtypeStruct((m_pad, n_pad), jnp.float32),
        grid=(m_pad // tm,),
        in_specs=[
            pl.BlockSpec((tm, in_size), lambda i: (i, 0)),             # A row tile
            pl.BlockSpec((in_size, order * n_pad), lambda i: (0, 0)),  # W (resident)
            pl.BlockSpec((1, order * n_pad), lambda i: (0, 0)),        # bias (resident)
        ],
        out_specs=pl.BlockSpec((tm, n_pad), lambda i: (i, 0)),
        compiler_params=pltpu.CompilerParams(
            dimension_semantics=("parallel",),      # shard row tiles across TCs (v7x)
            vmem_limit_bytes=32 * 1024 * 1024,      # portable v5e/v6e/v7x budget
        ),
    )(a, w, b_cat)

    # strip row / lane padding (cheap XLA slice) and restore leading dims
    return out[:m, :out_size].reshape(*lead, out_size)


# ----------------------------------------------------------------------------
# parameter init (nn.Linear-style U(-1/sqrt(in), 1/sqrt(in))) packed lane-dense
# ----------------------------------------------------------------------------
def init_polyfc_params(key, in_size, out_size, order):
    n_pad = _round_up(out_size, 128)
    bound = 1.0 / math.sqrt(in_size)
    keys = jax.random.split(key, 2 * order)
    weights, biases = [], []
    w_cat = jnp.zeros((in_size, order * n_pad), jnp.float32)
    b_cat = jnp.zeros((1, order * n_pad), jnp.float32)
    for i in range(order):
        w = jax.random.uniform(keys[2 * i], (in_size, out_size),
                               jnp.float32, -bound, bound)
        b = jax.random.uniform(keys[2 * i + 1], (out_size,),
                               jnp.float32, -bound, bound)
        weights.append(w)
        biases.append(b)
        w_cat = w_cat.at[:, i * n_pad:i * n_pad + out_size].set(w)
        b_cat = b_cat.at[0, i * n_pad:i * n_pad + out_size].set(b)
    return {
        "w_cat": w_cat, "b_cat": b_cat,
        # unpacked copies kept only for the pure-JAX reference check
        "weights": weights, "biases": biases,
    }


def polyfc_reference(params, x):
    """Pure-JAX f32 reference of the PyTorch forward."""
    y = None
    for w, b in zip(params["weights"], params["biases"]):
        x_i = x @ w + b
        y = x_i if y is None else y * x_i + x_i
    return jnp.maximum(y, 0.0)


if __name__ == "__main__":
    key = jax.random.PRNGKey(0)
    pkey, xkey = jax.random.split(key)

    # small shapes consistent with the module: x (batch, seq, in_size)
    batch, seq, in_size, out_size, order = 2, 64, 32, 48, 3
    params = init_polyfc_params(pkey, in_size, out_size, order)
    x = jax.random.normal(xkey, (batch, seq, in_size), jnp.float32)

    fwd = jax.jit(partial(polyfc_forward, out_size=out_size, order=order))
    y = fwd(x, params["w_cat"], params["b_cat"])
    jax.block_until_ready(y)

    assert y.shape == (batch, seq, out_size) and y.dtype == jnp.float32

    # pure-JAX f32 reference; bf16 MXU inputs => loose tolerance
    ref = polyfc_reference(params, x.reshape(-1, in_size)).reshape(batch, seq, out_size)
    max_err = float(jnp.max(jnp.abs(y - ref)))
    scale = float(jnp.max(jnp.abs(ref))) + 1.0
    assert max_err / scale < 2e-2, f"numerical mismatch: max_err={max_err}"

    print("KERNEL_OK")
</pallas_src>

<mosaic_0001>
module attributes {stable_mosaic.version = 11 : i64} {
  func.func @_polyfc_kernel(%arg0: i32, %arg1: memref<64x32xbf16, #tpu.memory_space<vmem>>, %arg2: memref<32x384xbf16, #tpu.memory_space<vmem>>, %arg3: memref<1x384xf32, #tpu.memory_space<vmem>>, %arg4: memref<64x128xf32, #tpu.memory_space<vmem>>) attributes {dimension_semantics = [#tpu.dimension_semantics<parallel>], iteration_bounds = array<i64: 2>, scalar_prefetch = 0 : i64, scratch_operands = 0 : i64, tpu.core_type = #tpu.core_type<tc>, window_params = [{transform_indices = @transform_0, window_bounds = array<i64: 64, 32>}, {pipeline_mode = #tpu.pipeline_mode<synchronous>, transform_indices = @transform_1, window_bounds = array<i64: 32, 384>}, {pipeline_mode = #tpu.pipeline_mode<synchronous>, transform_indices = @transform_2, window_bounds = array<i64: 1, 384>}, {transform_indices = @transform_3, window_bounds = array<i64: 64, 128>}]} {
    %c0 = arith.constant 0 : index
    %c0_0 = arith.constant 0 : index
    %0 = vector.load %arg1[%c0, %c0_0] : memref<64x32xbf16, #tpu.memory_space<vmem>>, vector<64x32xbf16>
    %c0_1 = arith.constant 0 : index
    %c0_2 = arith.constant 0 : index
    %1 = vector.load %arg2[%c0_1, %c0_2] : memref<32x384xbf16, #tpu.memory_space<vmem>>, vector<32x384xbf16>
    %cst = arith.constant dense<0.000000e+00> : vector<64x384xf32>
    %2 = tpu.matmul %0, %1, %cst {dimension_numbers = #tpu.dot_dimension_numbers<[1], [0], [0], [1], [0, 0, 1, 1], [], []>} : vector<64x32xbf16>, vector<32x384xbf16>, vector<64x384xf32> -> vector<64x384xf32>
    %c0_3 = arith.constant 0 : index
    %c0_4 = arith.constant 0 : index
    %3 = vector.load %arg3[%c0_3, %c0_4] : memref<1x384xf32, #tpu.memory_space<vmem>>, vector<1x384xf32>
    %4 = vector.broadcast %3 : vector<1x384xf32> to vector<64x384xf32>
    %5 = arith.addf %2, %4 : vector<64x384xf32>
    %6 = vector.extract_strided_slice %5 {offsets = [0, 0], sizes = [64, 128], strides = [1, 1]} : vector<64x384xf32> to vector<64x128xf32>
    %7 = vector.extract_strided_slice %5 {offsets = [0, 128], sizes = [64, 128], strides = [1, 1]} : vector<64x384xf32> to vector<64x128xf32>
    %8 = arith.mulf %6, %7 : vector<64x128xf32>
    %9 = arith.addf %8, %7 : vector<64x128xf32>
    %10 = vector.extract_strided_slice %5 {offsets = [0, 256], sizes = [64, 128], strides = [1, 1]} : vector<64x384xf32> to vector<64x128xf32>
    %11 = arith.mulf %9, %10 : vector<64x128xf32>
    %12 = arith.addf %11, %10 : vector<64x128xf32>
    %cst_5 = arith.constant 0.000000e+00 : f32
    %13 = vector.broadcast %cst_5 : f32 to vector<64x128xf32>
    %14 = arith.maximumf %12, %13 : vector<64x128xf32>
    %c0_6 = arith.constant 0 : index
    %c0_7 = arith.constant 0 : index
    %15 = vector.load %arg4[%c0_6, %c0_7] : memref<64x128xf32, #tpu.memory_space<vmem>>, vector<64x128xf32>
    tpu.vector_store %arg4[%c0_6, %c0_7], %14 {strides = array<i32>} : memref<64x128xf32, #tpu.memory_space<vmem>>, vector<64x128xf32>,
    return
  }
  func.func @transform_0(%arg0: i32) -> (i32, i32) {
    %c0_i32 = arith.constant 0 : i32
    %c0_i32_0 = arith.constant 0 : i32
    return %arg0, %c0_i32 : i32, i32
  }
  func.func @transform_1(%arg0: i32) -> (i32, i32) {
    %c0_i32 = arith.constant 0 : i32
    %c0_i32_0 = arith.constant 0 : i32
    %c0_i32_1 = arith.constant 0 : i32
    return %c0_i32, %c0_i32_0 : i32, i32
  }
  func.func @transform_2(%arg0: i32) -> (i32, i32) {
    %c0_i32 = arith.constant 0 : i32
    %c0_i32_0 = arith.constant 0 : i32
    %c0_i32_1 = arith.constant 0 : i32
    return %c0_i32, %c0_i32_0 : i32, i32
  }
  func.func @transform_3(%arg0: i32) -> (i32, i32) {
    %c0_i32 = arith.constant 0 : i32
    %c0_i32_0 = arith.constant 0 : i32
    return %arg0, %c0_i32 : i32, i32
  }
}

</mosaic_0001>

<bundles_post_ra>
// kernel: polyfc_forward.1
= control target key start
LH: loop header
LB: loop body
LE: loop exit
PB: predicated region body
PF: predicated region fallthrough
CT: control target
= control target key end

     0   :  { %s570_s12 = smov 0   ;;  %s682_s0 = inlined_call_operand.vmem [shape: bf16[128,32], index: 0, kind: input, shape index: {}]   ;;  %s683_s1 = inlined_call_operand.vmem [shape: bf16[32,384], index: 1, kind: input, shape index: {}]   ;;  %s684_s2 = inlined_call_operand.vmem [shape: f32[1,384], index: 2, kind: input, shape index: {}]   ;;  %s685_s3 = inlined_call_operand.vmem [shape: f32[128,128], index: 3, kind: output, shape index: {}]  }
   0x1 LB: > { %s455_s13 = sadd.s32 4294967295, %s548_s12   ;;  %p459_p0 = scmp.ge.s32.totalorder %s548_s12, 1  ;;  %s548_s12 = sphi %s570_s12, %s13_s12  }
   0x2   : > { %p138_p1 = scmp.lt.s32.totalorder %s548_s12, 3 }
   0x4   : > { %p139_p2 = pnand %p459_p0, %p138_p1 }
   0x5   : > { %s460_s11 = sshll.u32 (!%p139_p2), %s455_s13, 3 }
   0x6   : > { %142 = sbr.rel (%p139_p2) target bundleno = 206 (0xce), region = 32  ;;  %p163_p3 = scmp.lt.s32.totalorder (!%p139_p2), %s460_s11, 15 }
   0xb   : > { %v494_v0 = vld [vmem:[%s683_s1 + $0x18] sm:$0xf]  ;;  %v526_v1 = vld [vmem:[%s683_s1 + $0x20] sm:$0xf0]  ;;  %v525_v2 = vld [vmem:[%s683_s1 + $0x1c] sm:$0xf] }
   0xc   : > { %v495_v3 = vor.u32 %v526_v1, %v494_v0  ;;  %v496_v4 = vld [vmem:[%s683_s1 + $0x24] sm:$0xf0]  ;;  %v502_v5 = vld [vmem:[%s683_s1 + $0x20] sm:$0xf]  ;;  %v527_v6 = vld [vmem:[%s683_s1 + $0x28] sm:$0xf0] }
   0xd   : > { %v499_v7 = vor.u32 %v525_v2, %v496_v4  ;;  %v503_v8 = vor.u32 %v527_v6, %v502_v5  ;;  %v482_v9 = vld [vmem:[%s683_s1] sm:$0xf]  ;;  %v523_v10 = vld [vmem:[%s683_s1 + $0x8] sm:$0xf0]  ;;  %v522_v11 = vld [vmem:[%s683_s1 + $0x4] sm:$0xf] }
   0xe   : > { %270 = vmatpush.bf16.msra.mxu0 %v495_v3  ;;  %528 = vmatpush.bf16.msra.mxu3 %v495_v3  ;;  %v483_v12 = vor.u32 %v523_v10, %v482_v9  ;;  %v484_v13 = vld [vmem:[%s683_s1 + $0xc] sm:$0xf0]  ;;  %v490_v14 = vld [vmem:[%s683_s1 + $0x8] sm:$0xf]  ;;  %v524_v15 = vld [vmem:[%s683_s1 + $0x10] sm:$0xf0] }
   0xf   : > { %530 = vmatpush.bf16.msra.mxu1 %v499_v7  ;;  %532 = vmatpush.bf16.msra.mxu2 %v503_v8  ;;  %v487_v16 = vor.u32 %v522_v11, %v484_v13  ;;  %v491_v17 = vor.u32 %v524_v15, %v490_v14  ;;  %s687_s11 = smov (!%p163_p3, %s460_s11), 15  ;;  %vm251_vm0 = vcmask 261120   ;;  %v191_v22 = vld [vmem:[%s684_s2] sm:$0x7] }
  0x10   : > { %s461_s14 = sshll.u32 %s687_s11, 2  ;;  %v635_v24 = vperm.slane %v191_v22, 1  ;;  %v637_v26 = vperm.slane %v191_v22, 0  ;;  %v640_v28 = vperm.slane %v191_v22, 2  ;;  %s463_s19 = sshll.u32 %s687_s11, 3 }
  0x11   : > { %s166_s17 = scalar_lea.vmem %s682_s0, %s461_s14  ;;  %s650_s22 = scalar_lea.vmem %s685_s3, %s463_s19 }
  0x12   : > { %271 = vmatpush.bf16.msra.mxu0 %v483_v12  ;;  %529 = vmatpush.bf16.msra.mxu3 %v483_v12  ;;  %v518_v18 = vld [vmem:[%s166_s17] sm:$0xff]  ;;  %v519_v19 = vld [vmem:[%s166_s17 + $0x8] sm:$0xff]  ;;  %v520_v20 = vld [vmem:[%s166_s17 + $0x10] sm:$0xff] }
  0x13   : > { %531 = vmatpush.bf16.msra.mxu1 %v487_v16  ;;  %533 = vmatpush.bf16.msra.mxu2 %v491_v17  ;;  %v521_v21 = vld [vmem:[%s166_s17 + $0x18] sm:$0xff] }
  0x15   : > { %504 = vmatmul.msk.bf16.vlgmr.msra.gmra.mxu0 %vm251_vm0, %v518_v18  ;;  %505 = vmatmul.msk.bf16.vlgmr.msra.gmra.mxu3 %vm251_vm0, %v519_v19 }
  0x16   : > { %299 = vmatpush.bf16.msrb.mxu0 %v499_v7  ;;  %509 = vmatmul.msk.bf16.vlgmr.msra.gmra.mxu1 %vm251_vm0, %v519_v19 }
  0x17   : > { %513 = vmatmul.msk.bf16.vlgmr.msra.gmra.mxu2 %vm251_vm0, %v519_v19 }
  0x1a   : > { %300 = vmatpush.bf16.msrb.mxu0 %v487_v16 }
  0x1e   : > { %328 = vmatpush.bf16.msra.mxu0 %v503_v8 }
  0x22   : > { %329 = vmatpush.bf16.msra.mxu0 %v491_v17 }
  0x25   : > { %506 = vmatmul.msk.bf16.gmra.mxu3 %vm251_vm0, %v520_v20  ;;  %508 = vmatmul.msk.bf16.vlgmr.msrb.gmra.mxu0 %vm251_vm0, %v518_v18 }
  0x26   : > { %510 = vmatmul.msk.bf16.gmra.mxu1 %vm251_vm0, %v520_v20 }
  0x27   : > { %514 = vmatmul.msk.bf16.gmra.mxu2 %vm251_vm0, %v520_v20 }
  0x35   : > { %507 = vmatmul.msk.bf16.gmra.mxu3 %vm251_vm0, %v521_v21  ;;  %512 = vmatmul.msk.bf16.vlgmr.msra.gmra.mxu0 %vm251_vm0, %v518_v18 }
  0x36   : > { %511 = vmatmul.msk.bf16.gmra.mxu1 %vm251_vm0, %v521_v21 }
  0x37   : > { %515 = vmatmul.msk.bf16.gmra.mxu2 %vm251_vm0, %v521_v21 }
  0x92   : > { %v273_v23 = vpop.f32.mrf.mxu0 }
  0x93   : > { %v307_v25 = vpop.f32.mrf.mxu1  ;;  %v274_v61 = vadd.f32 %v273_v23, %v637_v26 }
  0x94   : > { %v308_v27 = vadd.f32 %v307_v25, %v635_v24 }
  0x98   : > { %v278_v29 = vpop.f32.mrf.mxu3 }
  0x99   : > { %v279_v30 = vadd.f32 %v278_v29, %v637_v26 }
  0x9a   : > { %v336_v31 = vpop.f32.mrf.mxu2  ;;  %v275_v32 = vpop.f32.mrf.mxu0 }
  0x9b   : > { %v353_v33 = vmul.f32 %v308_v27, %v279_v30  ;;  %v337_v34 = vadd.f32 %v336_v31, %v640_v28  ;;  %v309_v35 = vpop.f32.mrf.mxu1  ;;  %v276_v12 = vadd.f32 %v275_v32, %v637_v26 }
  0x9c   : > { %v310_v40 = vadd.f32 %v309_v35, %v635_v24 }
  0x9d   : > { %v361_v36 = vadd.f32 %v353_v33, %v308_v27 }
  0x9f   : > { %v369_v37 = vmul.f32 %v361_v36, %v337_v34 }
  0xa0   : > { %v280_v38 = vpop.f32.mrf.mxu3 }
  0xa1   : > { %v377_v39 = vadd.f32 %v369_v37, %v337_v34  ;;  %v281_v41 = vadd.f32 %v280_v38, %v637_v26 }
  0xa2   : > { %v338_v42 = vpop.f32.mrf.mxu2  ;;  %v302_v43 = vpop.f32.mrf.mxu0 }
  0xa3   : > { %v385_v44 = vmax.f32 %v377_v39, 0.0  ;;  %v354_v45 = vmul.f32 %v310_v40, %v281_v41  ;;  %v312_v46 = vpop.f32.mrf.mxu1  ;;  %v339_v47 = vadd.f32 %v338_v42, %v640_v28  ;;  %v303_v57 = vadd.f32 %v302_v43, %v635_v24 }
  0xa4   : > { %v313_v50 = vadd.f32 %v312_v46, %v635_v24 }
  0xa5   : > { %393 = vst [vmem:[%s650_s22 + $0x10] sm:$0xff] %v385_v44  ;;  %v362_v48 = vadd.f32 %v354_v45, %v310_v40  ;;  %v351_v63 = vmul.f32 %v303_v57, %v274_v61 }
  0xa7   : > { %v370_v49 = vmul.f32 %v362_v48, %v339_v47  ;;  %v359_v8 = vadd.f32 %v351_v63, %v303_v57 }
  0xa8   : > { %v283_v51 = vpop.f32.mrf.mxu3 }
  0xa9   : > { %v378_v52 = vadd.f32 %v370_v49, %v339_v47  ;;  %v284_v53 = vadd.f32 %v283_v51, %v637_v26 }
  0xaa   : > { %v341_v54 = vpop.f32.mrf.mxu2  ;;  %v304_v55 = vpop.f32.mrf.mxu0 }
  0xab   : > { %v386_v56 = vmax.f32 %v378_v52, 0.0  ;;  %v355_v58 = vmul.f32 %v313_v50, %v284_v53  ;;  %v342_v59 = vadd.f32 %v341_v54, %v640_v28  ;;  %v314_v60 = vpop.f32.mrf.mxu1  ;;  %v305_v6 = vadd.f32 %v304_v55, %v635_v24 }
  0xac   : > { %v315_v3 = vadd.f32 %v314_v60, %v635_v24 }
  0xad   : > { %394 = vst [vmem:[%s650_s22 + $0x18] sm:$0xff] %v386_v56  ;;  %v363_v62 = vadd.f32 %v355_v58, %v313_v50  ;;  %v352_v17 = vmul.f32 %v305_v6, %v276_v12 }
  0xaf   : > { %v371_v0 = vmul.f32 %v363_v62, %v342_v59  ;;  %v360_v29 = vadd.f32 %v352_v17, %v305_v6 }
  0xb0   : > { %v285_v1 = vpop.f32.mrf.mxu3 }
  0xb1   : > { %v379_v2 = vadd.f32 %v371_v0, %v342_v59  ;;  %v286_v4 = vadd.f32 %v285_v1, %v637_v26 }
  0xb2   : > { %v343_v5 = vpop.f32.mrf.mxu2  ;;  %v331_v7 = vpop.f32.mrf.mxu0 }
  0xb3   : > { %v387_v9 = vmax.f32 %v379_v2, 0.0  ;;  %v356_v10 = vmul.f32 %v315_v3, %v286_v4  ;;  %v332_v11 = vadd.f32 %v331_v7, %v640_v28  ;;  %v317_v13 = vpop.f32.mrf.mxu1  ;;  %v344_v14 = vadd.f32 %v343_v5, %v640_v28 }
  0xb4   : > { %v318_v19 = vadd.f32 %v317_v13, %v635_v24 }
  0xb5   : > { %395 = vst [vmem:[%s650_s22 + $0x20] sm:$0xff] %v387_v9  ;;  %v364_v15 = vadd.f32 %v356_v10, %v315_v3  ;;  %v367_v16 = vmul.f32 %v359_v8, %v332_v11 }
  0xb7   : > { %v372_v18 = vmul.f32 %v364_v15, %v344_v14  ;;  %v375_v20 = vadd.f32 %v367_v16, %v332_v11 }
  0xb8   : > { %v288_v21 = vpop.f32.mrf.mxu3 }
  0xb9   : > { %v380_v22 = vadd.f32 %v372_v18, %v344_v14  ;;  %v383_v23 = vmax.f32 %v375_v20, 0.0  ;;  %v289_v25 = vadd.f32 %v288_v21, %v637_v26 }
  0xba   : > { %v346_v27 = vpop.f32.mrf.mxu2  ;;  %v333_v30 = vpop.f32.mrf.mxu0 }
  0xbb   : > { %v388_v31 = vmax.f32 %v380_v22, 0.0  ;;  %391 = vst [vmem:[%s650_s22] sm:$0xff] %v383_v23  ;;  %v357_v32 = vmul.f32 %v318_v19, %v289_v25  ;;  %v347_v33 = vadd.f32 %v346_v27, %v640_v28  ;;  %v334_v34 = vadd.f32 %v333_v30, %v640_v28  ;;  %v319_v37 = vpop.f32.mrf.mxu1 }
  0xbc   : > { %v320_v42 = vadd.f32 %v319_v37, %v635_v24 }
  0xbd   : > { %396 = vst [vmem:[%s650_s22 + $0x28] sm:$0xff] %v388_v31  ;;  %v365_v35 = vadd.f32 %v357_v32, %v318_v19  ;;  %v368_v36 = vmul.f32 %v360_v29, %v334_v34 }
  0xbf   : > { %v373_v38 = vmul.f32 %v365_v35, %v347_v33  ;;  %v376_v39 = vadd.f32 %v368_v36, %v334_v34 }
  0xc0   : > { %v290_v40 = vpop.f32.mrf.mxu3 }
  0xc1   : > { %v381_v41 = vadd.f32 %v373_v38, %v347_v33  ;;  %v384_v43 = vmax.f32 %v376_v39, 0.0  ;;  %v291_v44 = vadd.f32 %v290_v40, %v637_v26 }
  0xc2   : > { %v348_v45 = vpop.f32.mrf.mxu2 }
  0xc3   : > { %v389_v46 = vmax.f32 %v381_v41, 0.0  ;;  %392 = vst [vmem:[%s650_s22 + $0x8] sm:$0xff] %v384_v43  ;;  %v358_v47 = vmul.f32 %v320_v42, %v291_v44  ;;  %v349_v48 = vadd.f32 %v348_v45, %v640_v28 }
  0xc5   : > { %397 = vst [vmem:[%s650_s22 + $0x30] sm:$0xff] %v389_v46  ;;  %v366_v49 = vadd.f32 %v358_v47, %v320_v42 }
  0xc7   : > { %v374_v50 = vmul.f32 %v366_v49, %v349_v48 }
  0xc9   : > { %v382_v51 = vadd.f32 %v374_v50, %v349_v48 }
  0xcb   : > { %v390_v52 = vmax.f32 %v382_v51, 0.0 }
  0xcd   : > { %398 = vst [vmem:[%s650_s22 + $0x38] sm:$0xff] %v390_v52 }
  0xce PF: > { %s13_s12 = sadd.s32 1, %s548_s12  }
  0xcf   : > { %p10_p4 = scmp.ge.s32.totalorder %s13_s12, 4  }
  0xd1   :  { %12 = sbr.rel (!%p10_p4) target bundleno = 1 (0x1), region = 62 }

</bundles_post_ra>
